<compile_context>
chip_gen: v7x
topology: tpu7x:2x2x1
jax: 0.10.0
libtpu: 0.0.40
codegen_flags: <defaults>
</compile_context>

<pallas_src>
import functools

import jax
import jax.numpy as jnp
from jax.experimental import pallas as pl
from jax.experimental.pallas import tpu as pltpu

_LANE = 128


def _round_up(n, m):
    return ((n + m - 1) // m) * m


def mlp_kernel(w1_ref, b1_ref, w2_ref, b2_ref, x_ref, out_ref, *, chunk):
    """One (F, TB) -> (O, TB) block of the 2-layer MLP, batch on the lane axis.

    w1_ref: (F, H) SMEM    b1_ref: (H,) SMEM
    w2_ref: (H, O) SMEM    b2_ref: (O,) SMEM
    x_ref : (F, TB) VMEM   out_ref: (O, TB) VMEM
    """
    F, TB = x_ref.shape
    H = b1_ref.shape[0]
    O = out_ref.shape[0]
    n_chunks = TB // chunk  # wrapper guarantees divisibility

    # Walk the tile in lane chunks so x rows, the h temp and the y accumulators
    # stay register-resident (~40 vregs live) even for large TB.
    @pl.loop(0, n_chunks)
    def _(c):
        s = pl.multiple_of(c * chunk, chunk)
        # Feature rows of this lane chunk: each is a lane-dense (1, chunk) vector.
        xs = [x_ref[f:f + 1, pl.ds(s, chunk)].astype(jnp.float32) for f in range(F)]

        ys = [None] * O
        for j in range(H):
            # hidden_j = relu( sum_f w1[f,j] * x[f,:] + b1[j] )   (all VPU FMAs,
            # weights are SMEM scalar broadcasts -> no XLU lane broadcasts)
            h = xs[0] * w1_ref[0, j]
            for f in range(1, F):
                h = h + xs[f] * w1_ref[f, j]
            h = jnp.maximum(h + b1_ref[j], 0.0)
            # y[o,:] += w2[j,o] * hidden_j
            for o in range(O):
                contrib = h * w2_ref[j, o]
                ys[o] = contrib if ys[o] is None else ys[o] + contrib

        # Lane-dense, unpadded stores of the (O, chunk) result.
        for o in range(O):
            out_ref[o:o + 1, pl.ds(s, chunk)] = (ys[o] + b2_ref[o]).astype(out_ref.dtype)


def net_forward(x, params, *, block_b=8192, chunk_lanes=1024):
    """Forward pass of Net. x:(B,F); params = (w1:(F,H), b1:(H,), w2:(H,O), b2:(O,))."""
    w1, b1, w2, b2 = params
    B, F = x.shape
    H = w1.shape[1]
    O = w2.shape[1]
    assert chunk_lanes % _LANE == 0

    lanes_needed = _round_up(B, _LANE)
    chunk = min(chunk_lanes, lanes_needed)

    # Number of grid steps: big tiles to amortize the ~0.35us per-step overhead,
    # but at least 2 steps (when the batch allows) so a "parallel" grid axis can
    # be split across v7x's two TensorCores.
    n_steps = pl.cdiv(B, block_b)
    if B >= 2 * chunk:
        n_steps = max(n_steps, 2)
    TB = _round_up(pl.cdiv(lanes_needed, n_steps), chunk)
    assert TB % chunk == 0
    grid = (pl.cdiv(B, TB),)  # ragged last block: Pallas masks the OOB writeback

    # Layout plumbing only: put the batch on the lane axis. No padding of B or O.
    xT = x.T  # (F, B)

    kernel = functools.partial(mlp_kernel, chunk=chunk)

    outT = pl.pallas_call(
        kernel,
        out_shape=jax.ShapeDtypeStruct((O, B), x.dtype),
        grid=grid,
        in_specs=[
            pl.BlockSpec(memory_space=pltpu.MemorySpace.SMEM),  # w1 (F, H)
            pl.BlockSpec(memory_space=pltpu.MemorySpace.SMEM),  # b1 (H,)
            pl.BlockSpec(memory_space=pltpu.MemorySpace.SMEM),  # w2 (H, O)
            pl.BlockSpec(memory_space=pltpu.MemorySpace.SMEM),  # b2 (O,)
            pl.BlockSpec((F, TB), lambda i: (0, i)),            # x  (F, B) tiled on lanes
        ],
        out_specs=pl.BlockSpec((O, TB), lambda i: (0, i)),
        compiler_params=pltpu.CompilerParams(
            dimension_semantics=("parallel",),
        ),
    )(w1, b1, w2, b2, xT)

    return outT.T  # (B, O)


def init_params(key, n_feature, n_hidden, n_output):
    """PyTorch nn.Linear-style uniform init. Weights are stored (in, out):
    the transpose from nn.Linear's (out, in) layout happens ONCE here, hoisted
    out of the forward path (no per-call parameter prep)."""
    kw1, kb1, kw2, kb2 = jax.random.split(key, 4)
    bound1 = 1.0 / (n_feature ** 0.5)
    w1 = jax.random.uniform(kw1, (n_feature, n_hidden), jnp.float32, -bound1, bound1)
    b1 = jax.random.uniform(kb1, (n_hidden,), jnp.float32, -bound1, bound1)
    bound2 = 1.0 / (n_hidden ** 0.5)
    w2 = jax.random.uniform(kw2, (n_hidden, n_output), jnp.float32, -bound2, bound2)
    b2 = jax.random.uniform(kb2, (n_output,), jnp.float32, -bound2, bound2)
    return w1, b1, w2, b2


def reference_forward(x, w1, b1, w2, b2):
    h = jnp.maximum(x @ w1 + b1, 0.0)
    return h @ w2 + b2


if __name__ == "__main__":
    # Tutorial shapes: Net(n_feature=2, n_hidden=10, n_output=2), batch = 100 + 100.
    n_feature, n_hidden, n_output = 2, 10, 2
    n_per_cluster = 100
    batch = 2 * n_per_cluster

    key = jax.random.PRNGKey(0)
    k0, k1, kp = jax.random.split(key, 3)

    # Synthetic two-cluster data mimicking torch.normal(+/-2, 1).
    x0 = jax.random.normal(k0, (n_per_cluster, n_feature), jnp.float32) + 2.0
    x1 = jax.random.normal(k1, (n_per_cluster, n_feature), jnp.float32) - 2.0
    x = jnp.concatenate([x0, x1], axis=0)

    params = init_params(kp, n_feature, n_hidden, n_output)
    ref = reference_forward(x, *params)

    # Path 1: default — single grid step for this small batch, no padding anywhere.
    out = net_forward(x, params)
    jax.block_until_ready(out)
    assert out.shape == (batch, n_output)
    assert jnp.allclose(out, ref, atol=1e-5, rtol=1e-5)

    # Path 2: force a 2-step parallel grid with a ragged last block
    # (what large batches take; also the v7x two-TensorCore path).
    out_tiled = net_forward(x, params, block_b=128, chunk_lanes=128)
    jax.block_until_ready(out_tiled)
    assert out_tiled.shape == (batch, n_output)
    assert jnp.allclose(out_tiled, ref, atol=1e-5, rtol=1e-5)

    # Path 3: force multiple in-kernel lane chunks inside one block
    # (exercises the vreg-pressure-bounding inner pl.loop).
    out_chunked = net_forward(x, params, block_b=8192, chunk_lanes=128)
    jax.block_until_ready(out_chunked)
    assert out_chunked.shape == (batch, n_output)
    assert jnp.allclose(out_chunked, ref, atol=1e-5, rtol=1e-5)

    print("KERNEL_OK")
</pallas_src>

<mosaic_0001>
module attributes {stable_mosaic.version = 11 : i64} {
  func.func @mlp_kernel(%arg0: i32, %arg1: memref<2x10xf32, #tpu.memory_space<smem>>, %arg2: memref<10xf32, #tpu.memory_space<smem>>, %arg3: memref<10x2xf32, #tpu.memory_space<smem>>, %arg4: memref<2xf32, #tpu.memory_space<smem>>, %arg5: memref<2x256xf32, #tpu.memory_space<vmem>>, %arg6: memref<2x256xf32, #tpu.memory_space<vmem>>) attributes {dimension_semantics = [#tpu.dimension_semantics<parallel>], iteration_bounds = array<i64: 1>, scalar_prefetch = 0 : i64, scratch_operands = 0 : i64, tpu.core_type = #tpu.core_type<tc>, window_params = [{transform_indices = @transform_0, window_bounds = array<i64: 2, 10>}, {transform_indices = @transform_1, window_bounds = array<i64: 10>}, {transform_indices = @transform_2, window_bounds = array<i64: 10, 2>}, {transform_indices = @transform_3, window_bounds = array<i64: 2>}, {transform_indices = @transform_4, window_bounds = array<i64: 2, 256>}, {transform_indices = @transform_5, window_bounds = array<i64: 2, 256>}]} {
    %c0_i32 = arith.constant 0 : i32
    %c1_i32 = arith.constant 1 : i32
    %0 = arith.muli %c0_i32, %c1_i32 : i32
    %c0_i32_0 = arith.constant 0 : i32
    %1 = arith.addi %c0_i32_0, %0 : i32
    %c256_i32 = arith.constant 256 : i32
    %2 = arith.muli %1, %c256_i32 : i32
    %3 = tpu.assume_multiple %2, 256 : i32
    %c0 = arith.constant 0 : index
    %4 = arith.index_cast %3 : i32 to index
    %5 = vector.load %arg5[%c0, %4] : memref<2x256xf32, #tpu.memory_space<vmem>>, vector<1x256xf32>
    %c1 = arith.constant 1 : index
    %6 = arith.index_cast %3 : i32 to index
    %7 = vector.load %arg5[%c1, %6] : memref<2x256xf32, #tpu.memory_space<vmem>>, vector<1x256xf32>
    %c0_1 = arith.constant 0 : index
    %c0_2 = arith.constant 0 : index
    %8 = memref.load %arg1[%c0_1, %c0_2] : memref<2x10xf32, #tpu.memory_space<smem>>
    %9 = vector.broadcast %8 : f32 to vector<1x256xf32>
    %10 = arith.mulf %5, %9 : vector<1x256xf32>
    %c1_3 = arith.constant 1 : index
    %c0_4 = arith.constant 0 : index
    %11 = memref.load %arg1[%c1_3, %c0_4] : memref<2x10xf32, #tpu.memory_space<smem>>
    %12 = vector.broadcast %11 : f32 to vector<1x256xf32>
    %13 = arith.mulf %7, %12 : vector<1x256xf32>
    %14 = arith.addf %10, %13 : vector<1x256xf32>
    %c0_5 = arith.constant 0 : index
    %15 = memref.load %arg2[%c0_5] : memref<10xf32, #tpu.memory_space<smem>>
    %16 = vector.broadcast %15 : f32 to vector<1x256xf32>
    %17 = arith.addf %14, %16 : vector<1x256xf32>
    %cst = arith.constant 0.000000e+00 : f32
    %18 = vector.broadcast %cst : f32 to vector<1x256xf32>
    %19 = arith.maximumf %17, %18 : vector<1x256xf32>
    %c0_6 = arith.constant 0 : index
    %c0_7 = arith.constant 0 : index
    %20 = memref.load %arg3[%c0_6, %c0_7] : memref<10x2xf32, #tpu.memory_space<smem>>
    %21 = vector.broadcast %20 : f32 to vector<1x256xf32>
    %22 = arith.mulf %19, %21 : vector<1x256xf32>
    %c0_8 = arith.constant 0 : index
    %c1_9 = arith.constant 1 : index
    %23 = memref.load %arg3[%c0_8, %c1_9] : memref<10x2xf32, #tpu.memory_space<smem>>
    %24 = vector.broadcast %23 : f32 to vector<1x256xf32>
    %25 = arith.mulf %19, %24 : vector<1x256xf32>
    %c0_10 = arith.constant 0 : index
    %c1_11 = arith.constant 1 : index
    %26 = memref.load %arg1[%c0_10, %c1_11] : memref<2x10xf32, #tpu.memory_space<smem>>
    %27 = vector.broadcast %26 : f32 to vector<1x256xf32>
    %28 = arith.mulf %5, %27 : vector<1x256xf32>
    %c1_12 = arith.constant 1 : index
    %c1_13 = arith.constant 1 : index
    %29 = memref.load %arg1[%c1_12, %c1_13] : memref<2x10xf32, #tpu.memory_space<smem>>
    %30 = vector.broadcast %29 : f32 to vector<1x256xf32>
    %31 = arith.mulf %7, %30 : vector<1x256xf32>
    %32 = arith.addf %28, %31 : vector<1x256xf32>
    %c1_14 = arith.constant 1 : index
    %33 = memref.load %arg2[%c1_14] : memref<10xf32, #tpu.memory_space<smem>>
    %34 = vector.broadcast %33 : f32 to vector<1x256xf32>
    %35 = arith.addf %32, %34 : vector<1x256xf32>
    %cst_15 = arith.constant 0.000000e+00 : f32
    %36 = vector.broadcast %cst_15 : f32 to vector<1x256xf32>
    %37 = arith.maximumf %35, %36 : vector<1x256xf32>
    %c1_16 = arith.constant 1 : index
    %c0_17 = arith.constant 0 : index
    %38 = memref.load %arg3[%c1_16, %c0_17] : memref<10x2xf32, #tpu.memory_space<smem>>
    %39 = vector.broadcast %38 : f32 to vector<1x256xf32>
    %40 = arith.mulf %37, %39 : vector<1x256xf32>
    %41 = arith.addf %22, %40 : vector<1x256xf32>
    %c1_18 = arith.constant 1 : index
    %c1_19 = arith.constant 1 : index
    %42 = memref.load %arg3[%c1_18, %c1_19] : memref<10x2xf32, #tpu.memory_space<smem>>
    %43 = vector.broadcast %42 : f32 to vector<1x256xf32>
    %44 = arith.mulf %37, %43 : vector<1x256xf32>
    %45 = arith.addf %25, %44 : vector<1x256xf32>
    %c0_20 = arith.constant 0 : index
    %c2 = arith.constant 2 : index
    %46 = memref.load %arg1[%c0_20, %c2] : memref<2x10xf32, #tpu.memory_space<smem>>
    %47 = vector.broadcast %46 : f32 to vector<1x256xf32>
    %48 = arith.mulf %5, %47 : vector<1x256xf32>
    %c1_21 = arith.constant 1 : index
    %c2_22 = arith.constant 2 : index
    %49 = memref.load %arg1[%c1_21, %c2_22] : memref<2x10xf32, #tpu.memory_space<smem>>
    %50 = vector.broadcast %49 : f32 to vector<1x256xf32>
    %51 = arith.mulf %7, %50 : vector<1x256xf32>
    %52 = arith.addf %48, %51 : vector<1x256xf32>
    %c2_23 = arith.constant 2 : index
    %53 = memref.load %arg2[%c2_23] : memref<10xf32, #tpu.memory_space<smem>>
    %54 = vector.broadcast %53 : f32 to vector<1x256xf32>
    %55 = arith.addf %52, %54 : vector<1x256xf32>
    %cst_24 = arith.constant 0.000000e+00 : f32
    %56 = vector.broadcast %cst_24 : f32 to vector<1x256xf32>
    %57 = arith.maximumf %55, %56 : vector<1x256xf32>
    %c2_25 = arith.constant 2 : index
    %c0_26 = arith.constant 0 : index
    %58 = memref.load %arg3[%c2_25, %c0_26] : memref<10x2xf32, #tpu.memory_space<smem>>
    %59 = vector.broadcast %58 : f32 to vector<1x256xf32>
    %60 = arith.mulf %57, %59 : vector<1x256xf32>
    %61 = arith.addf %41, %60 : vector<1x256xf32>
    %c2_27 = arith.constant 2 : index
    %c1_28 = arith.constant 1 : index
    %62 = memref.load %arg3[%c2_27, %c1_28] : memref<10x2xf32, #tpu.memory_space<smem>>
    %63 = vector.broadcast %62 : f32 to vector<1x256xf32>
    %64 = arith.mulf %57, %63 : vector<1x256xf32>
    %65 = arith.addf %45, %64 : vector<1x256xf32>
    %c0_29 = arith.constant 0 : index
    %c3 = arith.constant 3 : index
    %66 = memref.load %arg1[%c0_29, %c3] : memref<2x10xf32, #tpu.memory_space<smem>>
    %67 = vector.broadcast %66 : f32 to vector<1x256xf32>
    %68 = arith.mulf %5, %67 : vector<1x256xf32>
    %c1_30 = arith.constant 1 : index
    %c3_31 = arith.constant 3 : index
    %69 = memref.load %arg1[%c1_30, %c3_31] : memref<2x10xf32, #tpu.memory_space<smem>>
    %70 = vector.broadcast %69 : f32 to vector<1x256xf32>
    %71 = arith.mulf %7, %70 : vector<1x256xf32>
    %72 = arith.addf %68, %71 : vector<1x256xf32>
    %c3_32 = arith.constant 3 : index
    %73 = memref.load %arg2[%c3_32] : memref<10xf32, #tpu.memory_space<smem>>
    %74 = vector.broadcast %73 : f32 to vector<1x256xf32>
    %75 = arith.addf %72, %74 : vector<1x256xf32>
    %cst_33 = arith.constant 0.000000e+00 : f32
    %76 = vector.broadcast %cst_33 : f32 to vector<1x256xf32>
    %77 = arith.maximumf %75, %76 : vector<1x256xf32>
    %c3_34 = arith.constant 3 : index
    %c0_35 = arith.constant 0 : index
    %78 = memref.load %arg3[%c3_34, %c0_35] : memref<10x2xf32, #tpu.memory_space<smem>>
    %79 = vector.broadcast %78 : f32 to vector<1x256xf32>
    %80 = arith.mulf %77, %79 : vector<1x256xf32>
    %81 = arith.addf %61, %80 : vector<1x256xf32>
    %c3_36 = arith.constant 3 : index
    %c1_37 = arith.constant 1 : index
    %82 = memref.load %arg3[%c3_36, %c1_37] : memref<10x2xf32, #tpu.memory_space<smem>>
    %83 = vector.broadcast %82 : f32 to vector<1x256xf32>
    %84 = arith.mulf %77, %83 : vector<1x256xf32>
    %85 = arith.addf %65, %84 : vector<1x256xf32>
    %c0_38 = arith.constant 0 : index
    %c4 = arith.constant 4 : index
    %86 = memref.load %arg1[%c0_38, %c4] : memref<2x10xf32, #tpu.memory_space<smem>>
    %87 = vector.broadcast %86 : f32 to vector<1x256xf32>
    %88 = arith.mulf %5, %87 : vector<1x256xf32>
    %c1_39 = arith.constant 1 : index
    %c4_40 = arith.constant 4 : index
    %89 = memref.load %arg1[%c1_39, %c4_40] : memref<2x10xf32, #tpu.memory_space<smem>>
    %90 = vector.broadcast %89 : f32 to vector<1x256xf32>
    %91 = arith.mulf %7, %90 : vector<1x256xf32>
    %92 = arith.addf %88, %91 : vector<1x256xf32>
    %c4_41 = arith.constant 4 : index
    %93 = memref.load %arg2[%c4_41] : memref<10xf32, #tpu.memory_space<smem>>
    %94 = vector.broadcast %93 : f32 to vector<1x256xf32>
    %95 = arith.addf %92, %94 : vector<1x256xf32>
    %cst_42 = arith.constant 0.000000e+00 : f32
    %96 = vector.broadcast %cst_42 : f32 to vector<1x256xf32>
    %97 = arith.maximumf %95, %96 : vector<1x256xf32>
    %c4_43 = arith.constant 4 : index
    %c0_44 = arith.constant 0 : index
    %98 = memref.load %arg3[%c4_43, %c0_44] : memref<10x2xf32, #tpu.memory_space<smem>>
    %99 = vector.broadcast %98 : f32 to vector<1x256xf32>
    %100 = arith.mulf %97, %99 : vector<1x256xf32>
    %101 = arith.addf %81, %100 : vector<1x256xf32>
    %c4_45 = arith.constant 4 : index
    %c1_46 = arith.constant 1 : index
    %102 = memref.load %arg3[%c4_45, %c1_46] : memref<10x2xf32, #tpu.memory_space<smem>>
    %103 = vector.broadcast %102 : f32 to vector<1x256xf32>
    %104 = arith.mulf %97, %103 : vector<1x256xf32>
    %105 = arith.addf %85, %104 : vector<1x256xf32>
    %c0_47 = arith.constant 0 : index
    %c5 = arith.constant 5 : index
    %106 = memref.load %arg1[%c0_47, %c5] : memref<2x10xf32, #tpu.memory_space<smem>>
    %107 = vector.broadcast %106 : f32 to vector<1x256xf32>
    %108 = arith.mulf %5, %107 : vector<1x256xf32>
    %c1_48 = arith.constant 1 : index
    %c5_49 = arith.constant 5 : index
    %109 = memref.load %arg1[%c1_48, %c5_49] : memref<2x10xf32, #tpu.memory_space<smem>>
    %110 = vector.broadcast %109 : f32 to vector<1x256xf32>
    %111 = arith.mulf %7, %110 : vector<1x256xf32>
    %112 = arith.addf %108, %111 : vector<1x256xf32>
    %c5_50 = arith.constant 5 : index
    %113 = memref.load %arg2[%c5_50] : memref<10xf32, #tpu.memory_space<smem>>
    %114 = vector.broadcast %113 : f32 to vector<1x256xf32>
    %115 = arith.addf %112, %114 : vector<1x256xf32>
    %cst_51 = arith.constant 0.000000e+00 : f32
    %116 = vector.broadcast %cst_51 : f32 to vector<1x256xf32>
    %117 = arith.maximumf %115, %116 : vector<1x256xf32>
    %c5_52 = arith.constant 5 : index
    %c0_53 = arith.constant 0 : index
    %118 = memref.load %arg3[%c5_52, %c0_53] : memref<10x2xf32, #tpu.memory_space<smem>>
    %119 = vector.broadcast %118 : f32 to vector<1x256xf32>
    %120 = arith.mulf %117, %119 : vector<1x256xf32>
    %121 = arith.addf %101, %120 : vector<1x256xf32>
    %c5_54 = arith.constant 5 : index
    %c1_55 = arith.constant 1 : index
    %122 = memref.load %arg3[%c5_54, %c1_55] : memref<10x2xf32, #tpu.memory_space<smem>>
    %123 = vector.broadcast %122 : f32 to vector<1x256xf32>
    %124 = arith.mulf %117, %123 : vector<1x256xf32>
    %125 = arith.addf %105, %124 : vector<1x256xf32>
    %c0_56 = arith.constant 0 : index
    %c6 = arith.constant 6 : index
    %126 = memref.load %arg1[%c0_56, %c6] : memref<2x10xf32, #tpu.memory_space<smem>>
    %127 = vector.broadcast %126 : f32 to vector<1x256xf32>
    %128 = arith.mulf %5, %127 : vector<1x256xf32>
    %c1_57 = arith.constant 1 : index
    %c6_58 = arith.constant 6 : index
    %129 = memref.load %arg1[%c1_57, %c6_58] : memref<2x10xf32, #tpu.memory_space<smem>>
    %130 = vector.broadcast %129 : f32 to vector<1x256xf32>
    %131 = arith.mulf %7, %130 : vector<1x256xf32>
    %132 = arith.addf %128, %131 : vector<1x256xf32>
    %c6_59 = arith.constant 6 : index
    %133 = memref.load %arg2[%c6_59] : memref<10xf32, #tpu.memory_space<smem>>
    %134 = vector.broadcast %133 : f32 to vector<1x256xf32>
    %135 = arith.addf %132, %134 : vector<1x256xf32>
    %cst_60 = arith.constant 0.000000e+00 : f32
    %136 = vector.broadcast %cst_60 : f32 to vector<1x256xf32>
    %137 = arith.maximumf %135, %136 : vector<1x256xf32>
    %c6_61 = arith.constant 6 : index
    %c0_62 = arith.constant 0 : index
    %138 = memref.load %arg3[%c6_61, %c0_62] : memref<10x2xf32, #tpu.memory_space<smem>>
    %139 = vector.broadcast %138 : f32 to vector<1x256xf32>
    %140 = arith.mulf %137, %139 : vector<1x256xf32>
    %141 = arith.addf %121, %140 : vector<1x256xf32>
    %c6_63 = arith.constant 6 : index
    %c1_64 = arith.constant 1 : index
    %142 = memref.load %arg3[%c6_63, %c1_64] : memref<10x2xf32, #tpu.memory_space<smem>>
    %143 = vector.broadcast %142 : f32 to vector<1x256xf32>
    %144 = arith.mulf %137, %143 : vector<1x256xf32>
    %145 = arith.addf %125, %144 : vector<1x256xf32>
    %c0_65 = arith.constant 0 : index
    %c7 = arith.constant 7 : index
    %146 = memref.load %arg1[%c0_65, %c7] : memref<2x10xf32, #tpu.memory_space<smem>>
    %147 = vector.broadcast %146 : f32 to vector<1x256xf32>
    %148 = arith.mulf %5, %147 : vector<1x256xf32>
    %c1_66 = arith.constant 1 : index
    %c7_67 = arith.constant 7 : index
    %149 = memref.load %arg1[%c1_66, %c7_67] : memref<2x10xf32, #tpu.memory_space<smem>>
    %150 = vector.broadcast %149 : f32 to vector<1x256xf32>
    %151 = arith.mulf %7, %150 : vector<1x256xf32>
    %152 = arith.addf %148, %151 : vector<1x256xf32>
    %c7_68 = arith.constant 7 : index
    %153 = memref.load %arg2[%c7_68] : memref<10xf32, #tpu.memory_space<smem>>
    %154 = vector.broadcast %153 : f32 to vector<1x256xf32>
    %155 = arith.addf %152, %154 : vector<1x256xf32>
    %cst_69 = arith.constant 0.000000e+00 : f32
    %156 = vector.broadcast %cst_69 : f32 to vector<1x256xf32>
    %157 = arith.maximumf %155, %156 : vector<1x256xf32>
    %c7_70 = arith.constant 7 : index
    %c0_71 = arith.constant 0 : index
    %158 = memref.load %arg3[%c7_70, %c0_71] : memref<10x2xf32, #tpu.memory_space<smem>>
    %159 = vector.broadcast %158 : f32 to vector<1x256xf32>
    %160 = arith.mulf %157, %159 : vector<1x256xf32>
    %161 = arith.addf %141, %160 : vector<1x256xf32>
    %c7_72 = arith.constant 7 : index
    %c1_73 = arith.constant 1 : index
    %162 = memref.load %arg3[%c7_72, %c1_73] : memref<10x2xf32, #tpu.memory_space<smem>>
    %163 = vector.broadcast %162 : f32 to vector<1x256xf32>
    %164 = arith.mulf %157, %163 : vector<1x256xf32>
    %165 = arith.addf %145, %164 : vector<1x256xf32>
    %c0_74 = arith.constant 0 : index
    %c8 = arith.constant 8 : index
    %166 = memref.load %arg1[%c0_74, %c8] : memref<2x10xf32, #tpu.memory_space<smem>>
    %167 = vector.broadcast %166 : f32 to vector<1x256xf32>
    %168 = arith.mulf %5, %167 : vector<1x256xf32>
    %c1_75 = arith.constant 1 : index
    %c8_76 = arith.constant 8 : index
    %169 = memref.load %arg1[%c1_75, %c8_76] : memref<2x10xf32, #tpu.memory_space<smem>>
    %170 = vector.broadcast %169 : f32 to vector<1x256xf32>
    %171 = arith.mulf %7, %170 : vector<1x256xf32>
    %172 = arith.addf %168, %171 : vector<1x256xf32>
    %c8_77 = arith.constant 8 : index
    %173 = memref.load %arg2[%c8_77] : memref<10xf32, #tpu.memory_space<smem>>
    %174 = vector.broadcast %173 : f32 to vector<1x256xf32>
    %175 = arith.addf %172, %174 : vector<1x256xf32>
    %cst_78 = arith.constant 0.000000e+00 : f32
    %176 = vector.broadcast %cst_78 : f32 to vector<1x256xf32>
    %177 = arith.maximumf %175, %176 : vector<1x256xf32>
    %c8_79 = arith.constant 8 : index
    %c0_80 = arith.constant 0 : index
    %178 = memref.load %arg3[%c8_79, %c0_80] : memref<10x2xf32, #tpu.memory_space<smem>>
    %179 = vector.broadcast %178 : f32 to vector<1x256xf32>
    %180 = arith.mulf %177, %179 : vector<1x256xf32>
    %181 = arith.addf %161, %180 : vector<1x256xf32>
    %c8_81 = arith.constant 8 : index
    %c1_82 = arith.constant 1 : index
    %182 = memref.load %arg3[%c8_81, %c1_82] : memref<10x2xf32, #tpu.memory_space<smem>>
    %183 = vector.broadcast %182 : f32 to vector<1x256xf32>
    %184 = arith.mulf %177, %183 : vector<1x256xf32>
    %185 = arith.addf %165, %184 : vector<1x256xf32>
    %c0_83 = arith.constant 0 : index
    %c9 = arith.constant 9 : index
    %186 = memref.load %arg1[%c0_83, %c9] : memref<2x10xf32, #tpu.memory_space<smem>>
    %187 = vector.broadcast %186 : f32 to vector<1x256xf32>
    %188 = arith.mulf %5, %187 : vector<1x256xf32>
    %c1_84 = arith.constant 1 : index
    %c9_85 = arith.constant 9 : index
    %189 = memref.load %arg1[%c1_84, %c9_85] : memref<2x10xf32, #tpu.memory_space<smem>>
    %190 = vector.broadcast %189 : f32 to vector<1x256xf32>
    %191 = arith.mulf %7, %190 : vector<1x256xf32>
    %192 = arith.addf %188, %191 : vector<1x256xf32>
    %c9_86 = arith.constant 9 : index
    %193 = memref.load %arg2[%c9_86] : memref<10xf32, #tpu.memory_space<smem>>
    %194 = vector.broadcast %193 : f32 to vector<1x256xf32>
    %195 = arith.addf %192, %194 : vector<1x256xf32>
    %cst_87 = arith.constant 0.000000e+00 : f32
    %196 = vector.broadcast %cst_87 : f32 to vector<1x256xf32>
    %197 = arith.maximumf %195, %196 : vector<1x256xf32>
    %c9_88 = arith.constant 9 : index
    %c0_89 = arith.constant 0 : index
    %198 = memref.load %arg3[%c9_88, %c0_89] : memref<10x2xf32, #tpu.memory_space<smem>>
    %199 = vector.broadcast %198 : f32 to vector<1x256xf32>
    %200 = arith.mulf %197, %199 : vector<1x256xf32>
    %201 = arith.addf %181, %200 : vector<1x256xf32>
    %c9_90 = arith.constant 9 : index
    %c1_91 = arith.constant 1 : index
    %202 = memref.load %arg3[%c9_90, %c1_91] : memref<10x2xf32, #tpu.memory_space<smem>>
    %203 = vector.broadcast %202 : f32 to vector<1x256xf32>
    %204 = arith.mulf %197, %203 : vector<1x256xf32>
    %205 = arith.addf %185, %204 : vector<1x256xf32>
    %c0_92 = arith.constant 0 : index
    %206 = memref.load %arg4[%c0_92] : memref<2xf32, #tpu.memory_space<smem>>
    %207 = vector.broadcast %206 : f32 to vector<1x256xf32>
    %208 = arith.addf %201, %207 : vector<1x256xf32>
    %c0_93 = arith.constant 0 : index
    %209 = arith.index_cast %3 : i32 to index
    %210 = vector.load %arg6[%c0_93, %209] : memref<2x256xf32, #tpu.memory_space<vmem>>, vector<1x256xf32>
    tpu.vector_store %arg6[%c0_93, %209], %208 {strides = array<i32>} : memref<2x256xf32, #tpu.memory_space<vmem>>, vector<1x256xf32>,
    %c1_94 = arith.constant 1 : index
    %211 = memref.load %arg4[%c1_94] : memref<2xf32, #tpu.memory_space<smem>>
    %212 = vector.broadcast %211 : f32 to vector<1x256xf32>
    %213 = arith.addf %205, %212 : vector<1x256xf32>
    %c1_95 = arith.constant 1 : index
    %214 = arith.index_cast %3 : i32 to index
    %215 = vector.load %arg6[%c1_95, %214] : memref<2x256xf32, #tpu.memory_space<vmem>>, vector<1x256xf32>
    tpu.vector_store %arg6[%c1_95, %214], %213 {strides = array<i32>} : memref<2x256xf32, #tpu.memory_space<vmem>>, vector<1x256xf32>,
    %c1_i32_96 = arith.constant 1 : i32
    return
  }
  func.func @transform_0(%arg0: i32) -> (i32, i32) {
    %c0_i32 = arith.constant 0 : i32
    %c0_i32_0 = arith.constant 0 : i32
    %c0_i32_1 = arith.constant 0 : i32
    return %c0_i32, %c0_i32_0 : i32, i32
  }
  func.func @transform_1(%arg0: i32) -> i32 {
    %c0_i32 = arith.constant 0 : i32
    %c0_i32_0 = arith.constant 0 : i32
    return %c0_i32 : i32
  }
  func.func @transform_2(%arg0: i32) -> (i32, i32) {
    %c0_i32 = arith.constant 0 : i32
    %c0_i32_0 = arith.constant 0 : i32
    %c0_i32_1 = arith.constant 0 : i32
    return %c0_i32, %c0_i32_0 : i32, i32
  }
  func.func @transform_3(%arg0: i32) -> i32 {
    %c0_i32 = arith.constant 0 : i32
    %c0_i32_0 = arith.constant 0 : i32
    return %c0_i32 : i32
  }
  func.func @transform_4(%arg0: i32) -> (i32, i32) {
    %c0_i32 = arith.constant 0 : i32
    %c0_i32_0 = arith.constant 0 : i32
    return %c0_i32, %arg0 : i32, i32
  }
  func.func @transform_5(%arg0: i32) -> (i32, i32) {
    %c0_i32 = arith.constant 0 : i32
    %c0_i32_0 = arith.constant 0 : i32
    return %c0_i32, %arg0 : i32, i32
  }
}

</mosaic_0001>

<bundles_post_ra>
// kernel: tpu_custom_call.1
= control target key start
LH: loop header
LB: loop body
LE: loop exit
PB: predicated region body
PF: predicated region fallthrough
CT: control target
= control target key end

     0   :  { %10 = vsyncpa [#allocation4], 0  ;;  %s655_s0 = inlined_call_operand.vmem [shape: f32[2,10], index: 0, kind: input, shape index: {}]   ;;  %s656_s1 = inlined_call_operand.vmem [shape: f32[10], index: 1, kind: input, shape index: {}]   ;;  %s657_s2 = inlined_call_operand.vmem [shape: f32[10,2], index: 2, kind: input, shape index: {}]   ;;  %s658_s3 = inlined_call_operand.vmem [shape: f32[2], index: 3, kind: input, shape index: {}]   ;;  %s659_s4 = inlined_call_operand.vmem [shape: f32[2,200], index: 4, kind: input, shape index: {}]   ;;  %s660_s5 = inlined_call_operand.hbm [shape: f32[2,200], index: 5, kind: output, shape index: {}]  }
   0x1   :  { %11 = vsyncpa [#allocation6], 0 }
   0x2   :  { %12 = vsyncpa [#allocation9], 0  ;;  %s30_s20 = sshll.u32 %s656_s1, 4  ;;  %s31_s20 = int_to_ptr.vmem [resolvable:$true] %s30_s20 }
   0x3   :  { %13 = vsyncpa [#allocation3], 0  ;;  %s20_s23 = sshll.u32 %s655_s0, 4  ;;  %s348_s24 = scalar_lea.vmem %s31_s20, 16  ;;  %s21_s23 = int_to_ptr.vmem [resolvable:$true] %s20_s23 }
   0x4   :  { %p349_p0 = scmp.ne.s32.totalorder %s31_s20, %s348_s24  ;;  %p353_p1 = scmp.lt.s32.totalorder %s31_s20, %s31_s20 }
   0x5   :  { %p354_p2 = scmp.lt.s32.totalorder %s348_s24, %s348_s24 }
   0x7   :  { %p355_p3 = por %p354_p2, %p353_p1 }
   0x9   :  { %p356_p4 = pnand %p355_p3, %p349_p0 }
   0xb   :  { %359 = shalt.err (!%p356_p4)
}
   0xc   :  { %s426_s25 = smov [#allocation5]   ;;  %s360_s26 = scalar_lea.vmem %s21_s23, 32 }
   0xd   :  { %33 = dma.vmem_to_smem %s31_s20, 16, %s426_s25, [#allocation6]  }
   0xe   :  { %p361_p5 = scmp.ne.s32.totalorder %s21_s23, %s360_s26  ;;  %p365_p6 = scmp.lt.s32.totalorder %s21_s23, %s21_s23 }
   0xf   :  { %p366_p7 = scmp.lt.s32.totalorder %s360_s26, %s360_s26 }
  0x11   :  { %p367_p8 = por %p366_p7, %p365_p6 }
  0x13   :  { %p368_p9 = pnand %p367_p8, %p361_p5 }
  0x15   :  { %371 = shalt.err (!%p368_p9)
}
  0x16   :  { %s427_s1 = smov [#allocation2]   ;;  %s39_s28 = sshll.u32 %s657_s2, 4  ;;  %s40_s28 = int_to_ptr.vmem [resolvable:$true] %s39_s28 }
  0x17   :  { %23 = dma.vmem_to_smem %s21_s23, 32, %s427_s1, [#allocation4]  }
  0x18   :  { %s52_s6 = sshll.u32 %s658_s3, 4  ;;  %s372_s7 = scalar_lea.vmem %s40_s28, 256  ;;  %s53_s6 = int_to_ptr.vmem [resolvable:$true] %s52_s6 }
  0x19   :  { %p373_p10 = scmp.ne.s32.totalorder %s40_s28, %s372_s7  ;;  %p377_p11 = scmp.lt.s32.totalorder %s40_s28, %s40_s28 }
  0x1a   :  { %p378_p12 = scmp.lt.s32.totalorder %s372_s7, %s372_s7 }
  0x1c   :  { %p379_p13 = por %p378_p12, %p377_p11 }
  0x1e   :  { %p380_p0 = pnand %p379_p13, %p373_p10 }
  0x20   :  { %383 = shalt.err (!%p380_p0)
}
  0x21   :  { %s428_s8 = smov [#allocation7]   ;;  %s429_s9 = smov 128  }
  0x22   :  { %s430_s10 = smov 8   ;;  %s384_s11 = scalar_lea.vmem %s53_s6, 16 }
  0x23   :  { %45 = dma.vmem_to_smem %s40_s28, 256, %s428_s8, [#allocation6], %s429_s9, %s429_s9, %s430_s10  }
  0x24   :  { %p385_p1 = scmp.ne.s32.totalorder %s53_s6, %s384_s11  ;;  %p389_p2 = scmp.lt.s32.totalorder %s53_s6, %s53_s6 }
  0x25   :  { %p390_p3 = scmp.lt.s32.totalorder %s384_s11, %s384_s11 }
  0x27   :  { %p391_p4 = por %p390_p3, %p389_p2 }
  0x29   :  { %p392_p5 = pnand %p391_p4, %p385_p1 }
  0x2b   :  { %395 = shalt.err (!%p392_p5)
}
  0x2c   :  { %s431_s2 = smov [#allocation8]  }
  0x2d   :  { %55 = dma.vmem_to_smem %s53_s6, 16, %s431_s2, [#allocation9]  }
  0x2e   :  { %418 = dma.done.wait [#allocation4], 32  }
  0x2f   :  { %419 = vsyncadd [#allocation4], 4294967264 }
  0x30   :  { %420 = dma.done.wait [#allocation6], 272  }
  0x31   :  { %421 = vsyncadd [#allocation6], 4294967024 }
  0x32   :  { %422 = dma.done.wait [#allocation9], 16  }
  0x33   :  { %423 = vsyncadd [#allocation9], 4294967280 }
  0x34   :  { %70 = sfence }
  0x35   :  { %s74_s3 = sld [smem:[#allocation2]]  ;;  %v482_v0 = vld [vmem:[%s659_s4] ss:$2 sm:$0x3]  ;;  %s489_s19 = sld [smem:[#allocation7 + $0x1]] }
  0x36   :  { %s293_s12 = sld [smem:[#allocation2 + $0x80]]  ;;  %v487_v1 = vld [vmem:[%s659_s4 + $0x1] ss:$2 sm:$0x3]  ;;  %s295_s20 = sld [smem:[#allocation2 + $0x1]] }
  0x37   :  { %s475_s13 = sld [smem:[#allocation5]]  ;;  %s296_s21 = sld [smem:[#allocation2 + $0x81]] }
  0x38   :  { %s477_s14 = sld [smem:[#allocation7]]  ;;  %s491_s22 = sld [smem:[#allocation5 + $0x1]] }
  0x39   :  { %s493_s23 = sld [smem:[#allocation7 + $0x80]]  ;;  %s495_s24 = sld [smem:[#allocation7 + $0x81]] }
  0x3a   :  { %s497_s25 = sld [smem:[#allocation2 + $0x2]]  ;;  %s503_s1 = sld [smem:[#allocation7 + $0x100]] }
  0x3b   :  { %s499_s26 = sld [smem:[#allocation2 + $0x82]]  ;;  %v75_v2 = vstv %s74_s3  ;;  %s507_s0 = sld [smem:[#allocation7 + $0x101]]  ;;  %v89_v12 = vstv %s489_s19 }
  0x3c   :  { %v78_v3 = vstv %s293_s12  ;;  %s501_s4 = sld [smem:[#allocation5 + $0x2]]  ;;  %v76_v4 = vmul.f32 %v75_v2, %v482_v0  ;;  %s509_s27 = sld [smem:[#allocation2 + $0x3]]  ;;  %v92_v7 = vstv %s295_s20 }
  0x3d   :  { %v79_v5 = vmul.f32 %v487_v1, %v78_v3  ;;  %v82_v6 = vstv %s475_s13  ;;  %s512_s28 = sld [smem:[#allocation2 + $0x83]]  ;;  %v93_v9 = vmul.f32 %v92_v7, %v482_v0  ;;  %v95_v10 = vstv %s296_s21  ;;  %s517_s30 = sld [smem:[#allocation7 + $0x180]] }
  0x3e   :  { %s514_s29 = sld [smem:[#allocation5 + $0x3]]  ;;  %v86_v11 = vstv %s477_s14  ;;  %v96_v13 = vmul.f32 %v487_v1, %v95_v10  ;;  %s522_s6 = sld [smem:[#allocation2 + $0x4]]  ;;  %v99_v15 = vstv %s491_s22 }
  0x3f   :  { %v80_v8 = vadd.f32 %v79_v5, %v76_v4  ;;  %s524_s7 = sld [smem:[#allocation2 + $0x84]]  ;;  %s529_s8 = sld [smem:[#allocation7 + $0x181]]  ;;  %v103_v19 = vstv %s493_s23  ;;  %v107_v23 = vstv %s495_s24 }
  0x40   :  { %v111_v16 = vstv %s497_s25  ;;  %s531_s9 = sld [smem:[#allocation5 + $0x4]]  ;;  %v97_v18 = vadd.f32 %v96_v13, %v93_v9  ;;  %s539_s10 = sld [smem:[#allocation2 + $0x5]]  ;;  %v122_v31 = vstv %s503_s1 }
  0x41   :  { %v83_v14 = vadd.f32 %v82_v6, %v80_v8  ;;  %v114_v17 = vstv %s499_s26  ;;  %v112_v20 = vmul.f32 %v111_v16, %v482_v0  ;;  %s541_s11 = sld [smem:[#allocation2 + $0x85]]  ;;  %v126_v32 = vstv %s507_s0  ;;  %s548_s2 = sld [smem:[#allocation7 + $0x200]] }
  0x42   :  { %v115_v21 = vmul.f32 %v487_v1, %v114_v17  ;;  %v118_v24 = vstv %s501_s4  ;;  %v130_v25 = vstv %s509_s27  ;;  %v100_v26 = vadd.f32 %v99_v15, %v97_v18  ;;  %s550_s3 = sld [smem:[#allocation5 + $0x5]]  ;;  %s553_s12 = sld [smem:[#allocation7 + $0x201]] }
  0x43   :  { %v84_v22 = vmax.f32 %v83_v14, 0.0  ;;  %v131_v28 = vmul.f32 %v130_v25, %v482_v0  ;;  %v133_v29 = vstv %s512_s28  ;;  %s555_s13 = sld [smem:[#allocation2 + $0x6]]  ;;  %v141_v39 = vstv %s517_s30  ;;  %s560_s14 = sld [smem:[#allocation7 + $0x280]] }
  0x44   :  { %v116_v27 = vadd.f32 %v115_v21, %v112_v20  ;;  %v134_v33 = vmul.f32 %v487_v1, %v133_v29  ;;  %v101_v35 = vmax.f32 %v100_v26, 0.0  ;;  %v137_v37 = vstv %s514_s29  ;;  %s563_s15 = sld [smem:[#allocation7 + $0x281]]  ;;  %s565_s16 = sld [smem:[#allocation2 + $0x86]] }
  0x45   :  { %v87_v30 = vmul.f32 %v86_v11, %v84_v22  ;;  %v90_v34 = vmul.f32 %v89_v12, %v84_v22  ;;  %v149_v40 = vstv %s522_s6  ;;  %v152_v41 = vstv %s524_s7  ;;  %s570_s17 = sld [smem:[#allocation5 + $0x6]]  ;;  %s572_s18 = sld [smem:[#allocation7 + $0x300]] }
  0x46   :  { %v119_v36 = vadd.f32 %v118_v24, %v116_v27  ;;  %v135_v38 = vadd.f32 %v134_v33, %v131_v28  ;;  %v104_v42 = vmul.f32 %v103_v19, %v101_v35  ;;  %v108_v43 = vmul.f32 %v107_v23, %v101_v35  ;;  %s574_s19 = sld [smem:[#allocation2 + $0x7]]  ;;  %s582_s21 = sld [smem:[#allocation7 + $0x301]] }
  0x47   :  { %v150_v45 = vmul.f32 %v149_v40, %v482_v0  ;;  %v145_v47 = vstv %s529_s8  ;;  %v153_v48 = vmul.f32 %v487_v1, %v152_v41  ;;  %v156_v49 = vstv %s531_s9  ;;  %s576_s20 = sld [smem:[#allocation2 + $0x87]]  ;;  %s587_s23 = sld [smem:[#allocation2 + $0x8]] }
  0x48   :  { %v120_v44 = vmax.f32 %v119_v36, 0.0  ;;  %v138_v46 = vadd.f32 %v137_v37, %v135_v38  ;;  %v105_v50 = vadd.f32 %v104_v42, %v87_v30  ;;  %v109_v51 = vadd.f32 %v108_v43, %v90_v34  ;;  %s584_s22 = sld [smem:[#allocation5 + $0x7]]  ;;  %s589_s24 = sld [smem:[#allocation2 + $0x88]] }
  0x49   :  { %v154_v55 = vadd.f32 %v153_v48, %v150_v45  ;;  %v168_v56 = vstv %s539_s10  ;;  %v171_v57 = vstv %s541_s11  ;;  %v175_v3 = vstv %s550_s3  ;;  %s594_s25 = sld [smem:[#allocation7 + $0x380]]  ;;  %s596_s26 = sld [smem:[#allocation7 + $0x381]] }
  0x4a   :  { %v123_v52 = vmul.f32 %v122_v31, %v120_v44  ;;  %v127_v53 = vmul.f32 %v126_v32, %v120_v44  ;;  %v139_v54 = vmax.f32 %v138_v46, 0.0  ;;  %v169_v60 = vmul.f32 %v168_v56, %v482_v0  ;;  %s599_s4 = sld [smem:[#allocation5 + $0x8]]  ;;  %s604_s1 = sld [smem:[#allocation2 + $0x9]] }
  0x4b   :  { %v172_v61 = vmul.f32 %v487_v1, %v171_v57  ;;  %v157_v2 = vadd.f32 %v156_v49, %v154_v55  ;;  %v160_v4 = vstv %s548_s2  ;;  %v164_v5 = vstv %s553_s12  ;;  %s606_s0 = sld [smem:[#allocation2 + $0x89]]  ;;  %s613_s27 = sld [smem:[#allocation7 + $0x400]] }
  0x4c   :  { %v124_v58 = vadd.f32 %v123_v52, %v105_v50  ;;  %v128_v59 = vadd.f32 %v127_v53, %v109_v51  ;;  %v142_v62 = vmul.f32 %v141_v39, %v139_v54  ;;  %v146_v63 = vmul.f32 %v145_v47, %v139_v54  ;;  %s616_s28 = sld [smem:[#allocation5 + $0x9]]  ;;  %s629_s30 = sld [smem:[#allocation7 + $0x480]] }
  0x4d   :  { %v173_v6 = vadd.f32 %v172_v61, %v169_v60  ;;  %v187_v7 = vstv %s555_s13  ;;  %v158_v10 = vmax.f32 %v157_v2, 0.0  ;;  %v179_v13 = vstv %s560_s14  ;;  %s620_s29 = sld [smem:[#allocation7 + $0x401]]  ;;  %s262_s7 = sld [smem:[#allocation8]] }
  0x4e   :  { %v143_v8 = vadd.f32 %v142_v62, %v124_v58  ;;  %v147_v9 = vadd.f32 %v146_v63, %v128_v59  ;;  %v188_v11 = vmul.f32 %v187_v7, %v482_v0  ;;  %v183_v14 = vstv %s563_s15  ;;  %s631_s6 = sld [smem:[#allocation7 + $0x481]]  ;;  %s432_s9 = smov [#allocation10]  }
  0x4f   :  { %v176_v12 = vadd.f32 %v175_v3, %v173_v6  ;;  %v190_v15 = vstv %s565_s16  ;;  %v161_v16 = vmul.f32 %v160_v4, %v158_v10  ;;  %v165_v17 = vmul.f32 %v164_v5, %v158_v10  ;;  %s340_s8 = sld [smem:[#allocation8 + $0x1]]  ;;  %s281_s10 = sshll.u32 %s432_s9, 4  ;;  %s282_s10 = int_to_ptr.vmem [resolvable:$true] %s281_s10 }
  0x50   :  { %v191_v18 = vmul.f32 %v487_v1, %v190_v15  ;;  %v194_v19 = vstv %s570_s17  ;;  %v198_v21 = vstv %s572_s18  ;;  %v206_v22 = vstv %s574_s19  ;;  %s396_s11 = scalar_lea.vmem %s282_s10, 64  ;;  %p401_p7 = scmp.lt.s32.totalorder %s282_s10, %s282_s10 }
  0x51   :  { %v177_v20 = vmax.f32 %v176_v12, 0.0  ;;  %v209_v23 = vstv %s576_s20  ;;  %v162_v24 = vadd.f32 %v161_v16, %v143_v8  ;;  %v166_v25 = vadd.f32 %v165_v17, %v147_v9  ;;  %p397_p6 = scmp.ne.s32.totalorder %s282_s10, %s396_s11  ;;  %p402_p8 = scmp.lt.s32.totalorder %s396_s11, %s396_s11 }
  0x52   :  { %v192_v26 = vadd.f32 %v191_v18, %v188_v11  ;;  %v207_v27 = vmul.f32 %v206_v22, %v482_v0  ;;  %v202_v30 = vstv %s582_s21  ;;  %v210_v31 = vmul.f32 %v487_v1, %v209_v23 }
  0x53   :  { %v180_v28 = vmul.f32 %v179_v13, %v177_v20  ;;  %v184_v29 = vmul.f32 %v183_v14, %v177_v20  ;;  %v213_v33 = vstv %s584_s22  ;;  %v225_v34 = vstv %s587_s23  ;;  %p403_p9 = por %p402_p8, %p401_p7 }
  0x54   :  { %v195_v32 = vadd.f32 %v194_v19, %v192_v26  ;;  %v228_v35 = vstv %s589_s24  ;;  %v211_v36 = vadd.f32 %v210_v31, %v207_v27  ;;  %v217_v37 = vstv %s594_s25 }
  0x55   :  { %v221_v38 = vstv %s596_s26  ;;  %v226_v39 = vmul.f32 %v225_v34, %v482_v0  ;;  %v181_v40 = vadd.f32 %v180_v28, %v162_v24  ;;  %v185_v41 = vadd.f32 %v184_v29, %v166_v25  ;;  %p404_p10 = pnand %p403_p9, %p397_p6 }
  0x56   :  { %v196_v42 = vmax.f32 %v195_v32, 0.0  ;;  %v229_v43 = vmul.f32 %v487_v1, %v228_v35  ;;  %v214_v44 = vadd.f32 %v213_v33, %v211_v36  ;;  %v232_v45 = vstv %s599_s4 }
  0x57   :  { %v244_v46 = vstv %s604_s1  ;;  %v247_v47 = vstv %s606_s0  ;;  %v236_v53 = vstv %s613_s27  ;;  %v251_v58 = vstv %s616_s28 }
  0x58   :  { %v199_v48 = vmul.f32 %v198_v21, %v196_v42  ;;  %v203_v49 = vmul.f32 %v202_v30, %v196_v42  ;;  %v230_v50 = vadd.f32 %v229_v43, %v226_v39  ;;  %v245_v51 = vmul.f32 %v244_v46, %v482_v0 }
  0x59   :  { %v215_v52 = vmax.f32 %v214_v44, 0.0  ;;  %v248_v54 = vmul.f32 %v487_v1, %v247_v47  ;;  %v240_v61 = vstv %s620_s29  ;;  %v255_v6 = vstv %s629_s30 }
  0x5a   :  { %v200_v55 = vadd.f32 %v199_v48, %v181_v40  ;;  %v204_v56 = vadd.f32 %v203_v49, %v185_v41  ;;  %v233_v57 = vadd.f32 %v232_v45, %v230_v50  ;;  %v259_v1 = vstv %s631_s6 }
  0x5b   :  { %v218_v59 = vmul.f32 %v217_v37, %v215_v52  ;;  %v222_v60 = vmul.f32 %v221_v38, %v215_v52  ;;  %v249_v62 = vadd.f32 %v248_v54, %v245_v51  ;;  %v265_v10 = vlaneseq }
  0x5c   :  { %v234_v63 = vmax.f32 %v233_v57, 0.0  ;;  %v263_v13 = vstv %s262_s7  ;;  %v271_v14 = vstv %s340_s8 }
  0x5d   :  { %v219_v2 = vadd.f32 %v218_v59, %v200_v55  ;;  %v223_v3 = vadd.f32 %v222_v60, %v204_v56  ;;  %v252_v0 = vadd.f32 %v251_v58, %v249_v62  ;;  %vm267_vm0 = vcmp.lt.s32.totalorder %v265_v10, 256 }
  0x5e   :  { %v237_v4 = vmul.f32 %v236_v53, %v234_v63  ;;  %v241_v5 = vmul.f32 %v240_v61, %v234_v63 }
  0x5f   :  { %v253_v7 = vmax.f32 %v252_v0, 0.0 }
  0x60   :  { %v238_v8 = vadd.f32 %v237_v4, %v219_v2  ;;  %v242_v9 = vadd.f32 %v241_v5, %v223_v3 }
  0x61   :  { %v256_v11 = vmul.f32 %v255_v6, %v253_v7  ;;  %v260_v12 = vmul.f32 %v259_v1, %v253_v7 }
  0x63   :  { %v257_v15 = vadd.f32 %v256_v11, %v238_v8  ;;  %v261_v16 = vadd.f32 %v260_v12, %v242_v9 }
  0x65   :  { %v264_v17 = vadd.f32 %v263_v13, %v257_v15  ;;  %v272_v18 = vadd.f32 %v271_v14, %v261_v16 }
  0x67   :  { %269 = vst.msk [vmem:[#allocation10] ss:$2 sm:$0x3] %vm267_vm0, %v264_v17  ;;  %274 = vst.msk [vmem:[#allocation10 + $0x1] ss:$2 sm:$0x3] %vm267_vm0, %v272_v18 }
  0x68   :  { %407 = shalt.err (!%p404_p10)
}
  0x69   :  { %s408_s12 = scalar_lea.hbm %s660_s5, 64 }
  0x6a   :  { %p409_p11 = scmp.ne.s32.totalorder %s660_s5, %s408_s12  ;;  %p412_p12 = scmp.lt.u32.totalorder %s408_s12, %s660_s5 }
  0x6c   :  { %p414_p13 = pnand %p412_p12, %p409_p11 }
  0x6e   :  { %417 = shalt.err (!%p414_p13)
}
  0x6f   :  { %284 = dma.vmem_to_hbm [thread:$0]  %s282_s10, 64, %s660_s5, [#allocation3]  }
  0x70   :  { %424 = dma.done.wait [#allocation3], 64  }
  0x71   :  { %425 = vsyncadd [#allocation3], 4294967232 }
  0x72   :  { %288 = vsyncpa [#allocation3], 1 }
  0x73   :  { %289 = vsyncpa [#allocation4], 1 }
  0x74   :  { %290 = vsyncpa [#allocation6], 1 }
  0x75   :  { %291 = vsyncpa [#allocation9], 1 }

</bundles_post_ra>
